<compile_context>
chip_gen: v7x
topology: tpu7x:2x2x1
jax: 0.10.0
libtpu: 0.0.40
codegen_flags: <defaults>
</compile_context>

<pallas_src>
import functools

import jax
import jax.numpy as jnp
from jax.experimental import pallas as pl
from jax.experimental.pallas import tpu as pltpu

HIDDEN = 128
LANE = 128


def _round_up(x, m):
    return (x + m - 1) // m * m


def pv_kernel(x_ref, w1_ref, b1_ref, w2_ref, b2_ref, wh_ref, bh_ref,
              out_ref, *, action_dim):
    # fc1 + relu  (x cast to bf16 in-kernel; bf16 x bf16 -> f32 accumulate on MXU)
    x = x_ref[...].astype(w1_ref.dtype)
    h1 = jnp.dot(x, w1_ref[...], preferred_element_type=jnp.float32) + b1_ref[...]
    h1 = jnp.maximum(h1, 0.0)

    # fc2 + relu
    h2 = jnp.dot(h1.astype(w2_ref.dtype), w2_ref[...],
                 preferred_element_type=jnp.float32) + b2_ref[...]
    h2 = jnp.maximum(h2, 0.0)

    # fused policy+value head: one lane-dense [TB, 128] matmul
    fused = jnp.dot(h2.astype(wh_ref.dtype), wh_ref[...],
                    preferred_element_type=jnp.float32) + bh_ref[...]

    col = jax.lax.broadcasted_iota(jnp.int32, fused.shape, 1)
    is_policy = col < action_dim
    is_value = col == action_dim

    # policy: numerically stable softmax over the real action columns only.
    logits = jnp.where(is_policy, fused, -jnp.inf)
    m = jnp.max(logits, axis=-1, keepdims=True)
    e = jnp.exp(logits - m)                        # padded cols -> exp(-inf) = 0
    denom = jnp.sum(e, axis=-1, keepdims=True)
    probs = e / denom                              # exact divide: rows sum to 1

    # value: pull out the single value column with a masked XLU reduce
    # (no lane slice), then tanh over [TB, 1] only (1 EUP lane/row, not 128).
    vcol = jnp.sum(jnp.where(is_value, fused, 0.0), axis=-1, keepdims=True)
    vals = jnp.tanh(vcol)

    out = jnp.where(is_policy, probs, jnp.where(is_value, vals, 0.0))
    out_ref[...] = out.astype(out_ref.dtype)


def prepare_params(params):
    """One-time packing/casting of weights (hoisted out of the forward path)."""
    action_dim = params["wp"].shape[1]
    head_pad = max(LANE, _round_up(action_dim + 1, LANE))

    wh = jnp.zeros((HIDDEN, head_pad), jnp.float32)
    wh = wh.at[:, :action_dim].set(params["wp"])
    wh = wh.at[:, action_dim:action_dim + 1].set(params["wv"])
    bh = jnp.zeros((1, head_pad), jnp.float32)
    bh = bh.at[:, :action_dim].set(params["bp"])
    bh = bh.at[:, action_dim:action_dim + 1].set(params["bv"])

    bf = jnp.bfloat16
    return dict(
        w1=params["w1"].astype(bf), b1=params["b1"],
        w2=params["w2"].astype(bf), b2=params["b2"],
        wh=wh.astype(bf), bh=bh,
        action_dim=int(action_dim), head_pad=int(head_pad),
    )


def _pick_block_b(B):
    if B <= 512:
        return B                                    # single low-latency tile
    # Large B: 512-1024-row tiles (multiple of 256), and always >= 2 grid steps
    # so v7x can shard the "parallel" batch axis over both TensorCores.
    return min(1024, _round_up(pl.cdiv(B, 2), 256))


def pv_network_forward(x, prepped, *, block_b=None):
    """x: [B, input_dim] float32. prepped: dict from prepare_params().

    Returns (policy [B, action_dim] f32, value [B, 1] f32).
    """
    B, input_dim = x.shape
    action_dim = prepped["action_dim"]
    head_pad = prepped["head_pad"]

    if block_b is None:
        block_b = _pick_block_b(B)
    grid = (pl.cdiv(B, block_b),)

    const = lambda i: (0, 0)  # weights/biases: same block every grid step
    in_specs = [
        pl.BlockSpec((block_b, input_dim), lambda i: (i, 0)),   # x tile (f32)
        pl.BlockSpec((input_dim, HIDDEN), const),               # w1 (bf16)
        pl.BlockSpec((1, HIDDEN), const),                       # b1
        pl.BlockSpec((HIDDEN, HIDDEN), const),                  # w2 (bf16)
        pl.BlockSpec((1, HIDDEN), const),                       # b2
        pl.BlockSpec((HIDDEN, head_pad), const),                # fused head W (bf16)
        pl.BlockSpec((1, head_pad), const),                     # fused head b
    ]
    out_spec = pl.BlockSpec((block_b, head_pad), lambda i: (i, 0))

    flops = 2 * B * (input_dim * HIDDEN + HIDDEN * HIDDEN + HIDDEN * head_pad)
    transcendentals = B * (head_pad + 1)            # exp over slab + tanh column
    weight_bytes = 2 * (input_dim * HIDDEN + HIDDEN * HIDDEN + HIDDEN * head_pad)
    bias_bytes = 4 * (2 * HIDDEN + head_pad)
    bytes_accessed = 4 * B * input_dim + 4 * B * head_pad + weight_bytes + bias_bytes

    out = pl.pallas_call(
        functools.partial(pv_kernel, action_dim=action_dim),
        out_shape=jax.ShapeDtypeStruct((B, head_pad), jnp.float32),
        grid=grid,
        in_specs=in_specs,
        out_specs=out_spec,
        compiler_params=pltpu.CompilerParams(
            dimension_semantics=("parallel",)),
        cost_estimate=pl.CostEstimate(
            flops=flops, transcendentals=transcendentals,
            bytes_accessed=bytes_accessed),
    )(x, prepped["w1"], prepped["b1"], prepped["w2"], prepped["b2"],
      prepped["wh"], prepped["bh"])

    policy = out[:, :action_dim]
    value = out[:, action_dim:action_dim + 1]
    return policy, value


def init_params(key, input_dim, action_dim, hidden=HIDDEN):
    """Deterministic synthetic init (uniform, roughly PyTorch-Linear-like scale)."""
    ks = jax.random.split(key, 8)

    def lin(kw, kb, fan_in, fan_out):
        bound = 1.0 / jnp.sqrt(jnp.float32(fan_in))
        w = jax.random.uniform(kw, (fan_in, fan_out), jnp.float32, -bound, bound)
        b = jax.random.uniform(kb, (1, fan_out), jnp.float32, -bound, bound)
        return w, b

    w1, b1 = lin(ks[0], ks[1], input_dim, hidden)
    w2, b2 = lin(ks[2], ks[3], hidden, hidden)
    wp, bp = lin(ks[4], ks[5], hidden, action_dim)
    wv, bv = lin(ks[6], ks[7], hidden, 1)
    return dict(w1=w1, b1=b1, w2=w2, b2=b2, wp=wp, bp=bp, wv=wv, bv=bv)


def pv_network_ref(x, p):
    """Pure-f32 JAX reference (exact PyTorch semantics)."""
    h1 = jnp.maximum(x @ p["w1"] + p["b1"], 0.0)
    h2 = jnp.maximum(h1 @ p["w2"] + p["b2"], 0.0)
    policy = jax.nn.softmax(h2 @ p["wp"] + p["bp"], axis=-1)
    value = jnp.tanh(h2 @ p["wv"] + p["bv"])
    return policy, value


def pv_network_ref_bf16(x, p):
    """Reference that mirrors the kernel's bf16 operand rounding (f32 accumulate)."""
    bf = jnp.bfloat16
    r = lambda a: a.astype(bf).astype(jnp.float32)
    h1 = jnp.maximum(r(x) @ r(p["w1"]) + p["b1"], 0.0)
    h2 = jnp.maximum(r(h1) @ r(p["w2"]) + p["b2"], 0.0)
    h2r = r(h2)
    policy = jax.nn.softmax(h2r @ r(p["wp"]) + p["bp"], axis=-1)
    value = jnp.tanh(h2r @ r(p["wv"]) + p["bv"])
    return policy, value


if __name__ == "__main__":
    key = jax.random.PRNGKey(0)
    k_x, k_p = jax.random.split(key)

    B, INPUT_DIM, ACTION_DIM = 8, 16, 8
    x = jax.random.normal(k_x, (B, INPUT_DIM), jnp.float32)
    params = init_params(k_p, INPUT_DIM, ACTION_DIM)
    prepped = prepare_params(params)

    policy, value = pv_network_forward(x, prepped)
    jax.block_until_ready((policy, value))

    assert policy.shape == (B, ACTION_DIM) and value.shape == (B, 1)

    # Tight check vs. a reference that applies the same bf16 operand rounding.
    p_bf, v_bf = pv_network_ref_bf16(x, params)
    assert jnp.allclose(policy, p_bf, atol=5e-3, rtol=5e-3)
    assert jnp.allclose(value, v_bf, atol=5e-3, rtol=5e-3)

    # Looser check vs. the exact f32 PyTorch-equivalent semantics.
    p_f32, v_f32 = pv_network_ref(x, params)
    assert jnp.allclose(policy, p_f32, atol=5e-2, rtol=5e-2)
    assert jnp.allclose(value, v_f32, atol=5e-2, rtol=5e-2)

    # Policy must be a proper distribution (exact divide -> tight).
    assert jnp.allclose(jnp.sum(policy, axis=-1), 1.0, atol=1e-3)

    print("KERNEL_OK")
</pallas_src>

<mosaic_0001>
module attributes {stable_mosaic.version = 11 : i64} {
  func.func @pv_kernel(%arg0: i32, %arg1: memref<8x16xf32, #tpu.memory_space<vmem>>, %arg2: memref<16x128xbf16, #tpu.memory_space<vmem>>, %arg3: memref<1x128xf32, #tpu.memory_space<vmem>>, %arg4: memref<128x128xbf16, #tpu.memory_space<vmem>>, %arg5: memref<1x128xf32, #tpu.memory_space<vmem>>, %arg6: memref<128x128xbf16, #tpu.memory_space<vmem>>, %arg7: memref<1x128xf32, #tpu.memory_space<vmem>>, %arg8: memref<8x128xf32, #tpu.memory_space<vmem>>) attributes {dimension_semantics = [#tpu.dimension_semantics<parallel>], iteration_bounds = array<i64: 1>, scalar_prefetch = 0 : i64, scratch_operands = 0 : i64, tpu.core_type = #tpu.core_type<tc>, window_params = [{transform_indices = @transform_0, window_bounds = array<i64: 8, 16>}, {pipeline_mode = #tpu.pipeline_mode<synchronous>, transform_indices = @transform_1, window_bounds = array<i64: 16, 128>}, {pipeline_mode = #tpu.pipeline_mode<synchronous>, transform_indices = @transform_2, window_bounds = array<i64: 1, 128>}, {pipeline_mode = #tpu.pipeline_mode<synchronous>, transform_indices = @transform_3, window_bounds = array<i64: 128, 128>}, {pipeline_mode = #tpu.pipeline_mode<synchronous>, transform_indices = @transform_4, window_bounds = array<i64: 1, 128>}, {pipeline_mode = #tpu.pipeline_mode<synchronous>, transform_indices = @transform_5, window_bounds = array<i64: 128, 128>}, {pipeline_mode = #tpu.pipeline_mode<synchronous>, transform_indices = @transform_6, window_bounds = array<i64: 1, 128>}, {transform_indices = @transform_7, window_bounds = array<i64: 8, 128>}]} {
    %c0 = arith.constant 0 : index
    %c0_0 = arith.constant 0 : index
    %0 = vector.load %arg1[%c0, %c0_0] : memref<8x16xf32, #tpu.memory_space<vmem>>, vector<8x16xf32>
    %1 = arith.truncf %0 : vector<8x16xf32> to vector<8x16xbf16>
    %c0_1 = arith.constant 0 : index
    %c0_2 = arith.constant 0 : index
    %2 = vector.load %arg2[%c0_1, %c0_2] : memref<16x128xbf16, #tpu.memory_space<vmem>>, vector<16x128xbf16>
    %cst = arith.constant dense<0.000000e+00> : vector<8x128xf32>
    %3 = tpu.matmul %1, %2, %cst {dimension_numbers = #tpu.dot_dimension_numbers<[1], [0], [0], [1], [0, 0, 1, 1], [], []>} : vector<8x16xbf16>, vector<16x128xbf16>, vector<8x128xf32> -> vector<8x128xf32>
    %c0_3 = arith.constant 0 : index
    %c0_4 = arith.constant 0 : index
    %4 = vector.load %arg3[%c0_3, %c0_4] : memref<1x128xf32, #tpu.memory_space<vmem>>, vector<1x128xf32>
    %5 = vector.broadcast %4 : vector<1x128xf32> to vector<8x128xf32>
    %6 = arith.addf %3, %5 : vector<8x128xf32>
    %cst_5 = arith.constant 0.000000e+00 : f32
    %7 = vector.broadcast %cst_5 : f32 to vector<8x128xf32>
    %8 = arith.maximumf %6, %7 : vector<8x128xf32>
    %9 = arith.truncf %8 : vector<8x128xf32> to vector<8x128xbf16>
    %c0_6 = arith.constant 0 : index
    %c0_7 = arith.constant 0 : index
    %10 = vector.load %arg4[%c0_6, %c0_7] : memref<128x128xbf16, #tpu.memory_space<vmem>>, vector<128x128xbf16>
    %cst_8 = arith.constant dense<0.000000e+00> : vector<8x128xf32>
    %11 = tpu.matmul %9, %10, %cst_8 {dimension_numbers = #tpu.dot_dimension_numbers<[1], [0], [0], [1], [0, 0, 1, 1], [], []>} : vector<8x128xbf16>, vector<128x128xbf16>, vector<8x128xf32> -> vector<8x128xf32>
    %c0_9 = arith.constant 0 : index
    %c0_10 = arith.constant 0 : index
    %12 = vector.load %arg5[%c0_9, %c0_10] : memref<1x128xf32, #tpu.memory_space<vmem>>, vector<1x128xf32>
    %13 = vector.broadcast %12 : vector<1x128xf32> to vector<8x128xf32>
    %14 = arith.addf %11, %13 : vector<8x128xf32>
    %cst_11 = arith.constant 0.000000e+00 : f32
    %15 = vector.broadcast %cst_11 : f32 to vector<8x128xf32>
    %16 = arith.maximumf %14, %15 : vector<8x128xf32>
    %17 = arith.truncf %16 : vector<8x128xf32> to vector<8x128xbf16>
    %c0_12 = arith.constant 0 : index
    %c0_13 = arith.constant 0 : index
    %18 = vector.load %arg6[%c0_12, %c0_13] : memref<128x128xbf16, #tpu.memory_space<vmem>>, vector<128x128xbf16>
    %cst_14 = arith.constant dense<0.000000e+00> : vector<8x128xf32>
    %19 = tpu.matmul %17, %18, %cst_14 {dimension_numbers = #tpu.dot_dimension_numbers<[1], [0], [0], [1], [0, 0, 1, 1], [], []>} : vector<8x128xbf16>, vector<128x128xbf16>, vector<8x128xf32> -> vector<8x128xf32>
    %c0_15 = arith.constant 0 : index
    %c0_16 = arith.constant 0 : index
    %20 = vector.load %arg7[%c0_15, %c0_16] : memref<1x128xf32, #tpu.memory_space<vmem>>, vector<1x128xf32>
    %21 = vector.broadcast %20 : vector<1x128xf32> to vector<8x128xf32>
    %22 = arith.addf %19, %21 : vector<8x128xf32>
    %23 = tpu.iota {dimensions = array<i32: 1>} : vector<8x128xi32>
    %c8_i32 = arith.constant 8 : i32
    %24 = vector.broadcast %c8_i32 : i32 to vector<8x128xi32>
    %25 = arith.cmpi slt, %23, %24 : vector<8x128xi32>
    %c8_i32_17 = arith.constant 8 : i32
    %26 = vector.broadcast %c8_i32_17 : i32 to vector<8x128xi32>
    %27 = arith.cmpi eq, %23, %26 : vector<8x128xi32>
    %cst_18 = arith.constant 0xFF800000 : f32
    %28 = vector.broadcast %cst_18 : f32 to vector<8x128xf32>
    %29 = arith.select %25, %22, %28 : vector<8x128xi1>, vector<8x128xf32>
    %cst_19 = arith.constant dense<0xFF800000> : vector<8xf32>
    %30 = vector.multi_reduction <maximumf>, %29, %cst_19 [1] : vector<8x128xf32> to vector<8xf32>
    %31 = vector.shape_cast %30 : vector<8xf32> to vector<8x1xf32>
    %32 = vector.broadcast %31 : vector<8x1xf32> to vector<8x128xf32>
    %33 = arith.subf %29, %32 : vector<8x128xf32>
    %34 = math.exp %33 : vector<8x128xf32>
    %cst_20 = arith.constant dense<0.000000e+00> : vector<8xf32>
    %35 = vector.multi_reduction <add>, %34, %cst_20 [1] : vector<8x128xf32> to vector<8xf32>
    %36 = vector.shape_cast %35 : vector<8xf32> to vector<8x1xf32>
    %37 = vector.broadcast %36 : vector<8x1xf32> to vector<8x128xf32>
    %38 = arith.divf %34, %37 : vector<8x128xf32>
    %cst_21 = arith.constant 0.000000e+00 : f32
    %39 = vector.broadcast %cst_21 : f32 to vector<8x128xf32>
    %40 = arith.select %27, %22, %39 : vector<8x128xi1>, vector<8x128xf32>
    %cst_22 = arith.constant dense<0.000000e+00> : vector<8xf32>
    %41 = vector.multi_reduction <add>, %40, %cst_22 [1] : vector<8x128xf32> to vector<8xf32>
    %42 = vector.shape_cast %41 : vector<8xf32> to vector<8x1xf32>
    %43 = math.tanh %42 : vector<8x1xf32>
    %cst_23 = arith.constant 0.000000e+00 : f32
    %44 = vector.shape_cast %43 : vector<8x1xf32> to vector<8x1xf32>
    %45 = vector.broadcast %44 : vector<8x1xf32> to vector<8x128xf32>
    %46 = vector.broadcast %cst_23 : f32 to vector<8x128xf32>
    %47 = arith.select %27, %45, %46 : vector<8x128xi1>, vector<8x128xf32>
    %48 = arith.select %25, %38, %47 : vector<8x128xi1>, vector<8x128xf32>
    %c0_24 = arith.constant 0 : index
    %c0_25 = arith.constant 0 : index
    %49 = vector.load %arg8[%c0_24, %c0_25] : memref<8x128xf32, #tpu.memory_space<vmem>>, vector<8x128xf32>
    tpu.vector_store %arg8[%c0_24, %c0_25], %48 {strides = array<i32>} : memref<8x128xf32, #tpu.memory_space<vmem>>, vector<8x128xf32>,
    return
  }
  func.func @transform_0(%arg0: i32) -> (i32, i32) {
    %c0_i32 = arith.constant 0 : i32
    %c0_i32_0 = arith.constant 0 : i32
    return %arg0, %c0_i32 : i32, i32
  }
  func.func @transform_1(%arg0: i32) -> (i32, i32) {
    %c0_i32 = arith.constant 0 : i32
    %c0_i32_0 = arith.constant 0 : i32
    %c0_i32_1 = arith.constant 0 : i32
    return %c0_i32, %c0_i32_0 : i32, i32
  }
  func.func @transform_2(%arg0: i32) -> (i32, i32) {
    %c0_i32 = arith.constant 0 : i32
    %c0_i32_0 = arith.constant 0 : i32
    %c0_i32_1 = arith.constant 0 : i32
    return %c0_i32, %c0_i32_0 : i32, i32
  }
  func.func @transform_3(%arg0: i32) -> (i32, i32) {
    %c0_i32 = arith.constant 0 : i32
    %c0_i32_0 = arith.constant 0 : i32
    %c0_i32_1 = arith.constant 0 : i32
    return %c0_i32, %c0_i32_0 : i32, i32
  }
  func.func @transform_4(%arg0: i32) -> (i32, i32) {
    %c0_i32 = arith.constant 0 : i32
    %c0_i32_0 = arith.constant 0 : i32
    %c0_i32_1 = arith.constant 0 : i32
    return %c0_i32, %c0_i32_0 : i32, i32
  }
  func.func @transform_5(%arg0: i32) -> (i32, i32) {
    %c0_i32 = arith.constant 0 : i32
    %c0_i32_0 = arith.constant 0 : i32
    %c0_i32_1 = arith.constant 0 : i32
    return %c0_i32, %c0_i32_0 : i32, i32
  }
  func.func @transform_6(%arg0: i32) -> (i32, i32) {
    %c0_i32 = arith.constant 0 : i32
    %c0_i32_0 = arith.constant 0 : i32
    %c0_i32_1 = arith.constant 0 : i32
    return %c0_i32, %c0_i32_0 : i32, i32
  }
  func.func @transform_7(%arg0: i32) -> (i32, i32) {
    %c0_i32 = arith.constant 0 : i32
    %c0_i32_0 = arith.constant 0 : i32
    return %arg0, %c0_i32 : i32, i32
  }
}

</mosaic_0001>

<bundles_post_ra>
// kernel: tpu_custom_call.1
= control target key start
LH: loop header
LB: loop body
LE: loop exit
PB: predicated region body
PF: predicated region fallthrough
CT: control target
= control target key end

     0   :  { %12 = vsyncpa [#allocation3], 0  ;;  %s794_s0 = inlined_call_operand.hbm [shape: f32[8,16], index: 0, kind: input, shape index: {}]   ;;  %s795_s1 = inlined_call_operand.hbm [shape: bf16[16,128], index: 1, kind: input, shape index: {}]   ;;  %s796_s2 = inlined_call_operand.vmem [shape: f32[1,128], index: 2, kind: input, shape index: {}]   ;;  %s797_s3 = inlined_call_operand.hbm [shape: bf16[128,128], index: 3, kind: input, shape index: {}]   ;;  %s798_s4 = inlined_call_operand.vmem [shape: f32[1,128], index: 4, kind: input, shape index: {}]   ;;  %s799_s5 = inlined_call_operand.hbm [shape: bf16[128,128], index: 5, kind: input, shape index: {}]   ;;  %s800_s6 = inlined_call_operand.vmem [shape: f32[1,128], index: 6, kind: input, shape index: {}]   ;;  %s801_s7 = inlined_call_operand.hbm [shape: f32[8,128], index: 7, kind: output, shape index: {}]  }
   0x1   :  { %13 = vsyncpa [#allocation6], 0 }
   0x2   :  { %14 = vsyncpa [#allocation9], 0 }
   0x3   :  { %15 = vsyncpa [#allocation4], 0  ;;  %s643_s24 = smov [#allocation5]   ;;  %s525_s28 = scalar_lea.hbm %s795_s1, 128 }
   0x4   :  { %s31_s25 = sshll.u32 %s643_s24, 4  ;;  %p526_p0 = scmp.ne.s32.totalorder %s795_s1, %s525_s28  ;;  %s32_s25 = int_to_ptr.vmem [resolvable:$true] %s31_s25 }
   0x5   :  { %p529_p1 = scmp.lt.u32.totalorder %s525_s28, %s795_s1 }
   0x7   :  { %p531_p2 = pnand %p529_p1, %p526_p0 }
   0x9   :  { %534 = shalt.err (!%p531_p2)
}
   0xa   :  { %s535_s10 = scalar_lea.vmem %s32_s25, 128  ;;  %p540_p4 = scmp.lt.s32.totalorder %s32_s25, %s32_s25 }
   0xb   :  { %p536_p3 = scmp.ne.s32.totalorder %s32_s25, %s535_s10  ;;  %p541_p5 = scmp.lt.s32.totalorder %s535_s10, %s535_s10 }
   0xd   :  { %p542_p6 = por %p541_p5, %p540_p4 }
   0xf   :  { %p543_p7 = pnand %p542_p6, %p536_p3 }
  0x11   :  { %546 = shalt.err (!%p543_p7)
}
  0x12   :  { %s644_s11 = smov 64   ;;  %s645_s12 = smov 4  }
  0x13   :  { %37 = dma.hbm_to_vmem [thread:$0]  %s795_s1, 128, %s32_s25, [#allocation6], %s644_s11, %s644_s11, %s645_s12  }
  0x14   :  { %s646_s15 = smov [#allocation2]   ;;  %s647_s17 = smov [#allocation7]  }
  0x15   :  { %s22_s16 = sshll.u32 %s646_s15, 4  ;;  %s45_s18 = sshll.u32 %s647_s17, 4  ;;  %s23_s16 = int_to_ptr.vmem [resolvable:$true] %s22_s16  ;;  %s46_s18 = int_to_ptr.vmem [resolvable:$true] %s45_s18 }
  0x16   :  { %s547_s21 = scalar_lea.hbm %s794_s0, 128 }
  0x17   :  { %p548_p8 = scmp.ne.s32.totalorder %s794_s0, %s547_s21  ;;  %p551_p9 = scmp.lt.u32.totalorder %s547_s21, %s794_s0 }
  0x19   :  { %p553_p10 = pnand %p551_p9, %p548_p8 }
  0x1b   :  { %556 = shalt.err (!%p553_p10)
}
  0x1c   :  { %s557_s1 = scalar_lea.vmem %s23_s16, 128  ;;  %p562_p12 = scmp.lt.s32.totalorder %s23_s16, %s23_s16 }
  0x1d   :  { %p558_p11 = scmp.ne.s32.totalorder %s23_s16, %s557_s1  ;;  %p563_p13 = scmp.lt.s32.totalorder %s557_s1, %s557_s1 }
  0x1f   :  { %p564_p0 = por %p563_p13, %p562_p12 }
  0x21   :  { %p565_p1 = pnand %p564_p0, %p558_p11 }
  0x23   :  { %568 = shalt.err (!%p565_p1)
}
  0x24   :  { %25 = dma.hbm_to_vmem [thread:$0]  %s794_s0, 128, %s23_s16, [#allocation3]  }
  0x25   :  { %s569_s30 = scalar_lea.hbm %s797_s3, 1024 }
  0x26   :  { %p570_p2 = scmp.ne.s32.totalorder %s797_s3, %s569_s30  ;;  %p573_p3 = scmp.lt.u32.totalorder %s569_s30, %s797_s3 }
  0x28   :  { %p575_p4 = pnand %p573_p3, %p570_p2 }
  0x2a   :  { %578 = shalt.err (!%p575_p4)
}
  0x2b   :  { %s579_s14 = scalar_lea.vmem %s46_s18, 1024  ;;  %p584_p6 = scmp.lt.s32.totalorder %s46_s18, %s46_s18 }
  0x2c   :  { %p580_p5 = scmp.ne.s32.totalorder %s46_s18, %s579_s14  ;;  %p585_p7 = scmp.lt.s32.totalorder %s579_s14, %s579_s14 }
  0x2e   :  { %p586_p8 = por %p585_p7, %p584_p6 }
  0x30   :  { %p587_p9 = pnand %p586_p8, %p580_p5 }
  0x32   :  { %590 = shalt.err (!%p587_p9)
}
  0x33   :  { %51 = dma.hbm_to_vmem [thread:$0]  %s797_s3, 1024, %s46_s18, [#allocation6], %s644_s11, %s644_s11, %s645_s12  }
  0x34   :  { %s648_s16 = smov [#allocation8]   ;;  %s591_s21 = scalar_lea.hbm %s799_s5, 1024 }
  0x35   :  { %s59_s17 = sshll.u32 %s648_s16, 4  ;;  %p592_p10 = scmp.ne.s32.totalorder %s799_s5, %s591_s21  ;;  %s60_s17 = int_to_ptr.vmem [resolvable:$true] %s59_s17 }
  0x36   :  { %p595_p11 = scmp.lt.u32.totalorder %s591_s21, %s799_s5 }
  0x38   :  { %p597_p12 = pnand %p595_p11, %p592_p10 }
  0x3a   :  { %600 = shalt.err (!%p597_p12)
}
  0x3b   :  { %s601_s1 = scalar_lea.vmem %s60_s17, 1024  ;;  %p606_p0 = scmp.lt.s32.totalorder %s60_s17, %s60_s17 }
  0x3c   :  { %p602_p13 = scmp.ne.s32.totalorder %s60_s17, %s601_s1  ;;  %p607_p1 = scmp.lt.s32.totalorder %s601_s1, %s601_s1 }
  0x3e   :  { %p608_p2 = por %p607_p1, %p606_p0 }
  0x40   :  { %p609_p3 = pnand %p608_p2, %p602_p13 }
  0x42   :  { %612 = shalt.err (!%p609_p3)
}
  0x43   :  { %65 = dma.hbm_to_vmem [thread:$0]  %s799_s5, 1024, %s60_s17, [#allocation9], %s644_s11, %s644_s11, %s645_s12  }
  0x44   :  { %635 = dma.done.wait [#allocation3], 128  }
  0x45   :  { %636 = vsyncadd [#allocation3], 4294967168 }
  0x46   :  { %637 = dma.done.wait [#allocation6], 1152  }
  0x47   :  { %638 = vsyncadd [#allocation6], 4294966144 }
  0x48   :  { %639 = dma.done.wait [#allocation9], 1024  }
  0x49   :  { %640 = vsyncadd [#allocation9], 4294966272  ;;  %v649_v0 = vmov 0.0   ;;  %vm650_vm0 = vmmov 0   ;;  %v502_v1 = vld [vmem:[#allocation5] sm:$0xff]   ;;  %v81_v2 = vld [vmem:[#allocation2] sm:$0xff]  ;;  %v368_v36 = vlaneseq }
  0x4a   :  { %447 = vmatprep.subr.bf16.mxu0 %v649_v0  ;;  %449 = vmatprep.mubr.msk.bf16.mxu0 %vm650_vm0, %v649_v0  ;;  %v82_v3 = vpack.c.bf16 %v81_v2, %v81_v2  ;;  %vm98_vm1 = vcmask 130048   ;;  %v503_v4 = vld [vmem:[#allocation7] sm:$0xff]   ;;  %v504_v5 = vld [vmem:[#allocation7 + $0x8] sm:$0xff]   ;;  %v505_v6 = vld [vmem:[#allocation7 + $0x10] sm:$0xff]  }
  0x4b   :  { %453 = vmatprep.subr.bf16.mxu1 %v649_v0  ;;  %469 = vmatprep.mubr.msk.bf16.mxu1 %vm650_vm0, %v649_v0  ;;  %v506_v7 = vld [vmem:[#allocation7 + $0x18] sm:$0xff]   ;;  %v507_v8 = vld [vmem:[#allocation7 + $0x20] sm:$0xff]   ;;  %v508_v9 = vld [vmem:[#allocation7 + $0x28] sm:$0xff]   ;;  %v369_v37 = vand.u32 127, %v368_v36 }
  0x4c   :  { %448 = vmatpush3.bf16.msra.mxu0 %v502_v1  ;;  %454 = vmatpush3.bf16.msra.mxu1 %v503_v4  ;;  %v509_v10 = vld [vmem:[#allocation7 + $0x30] sm:$0xff]   ;;  %v510_v11 = vld [vmem:[#allocation7 + $0x38] sm:$0xff]   ;;  %v511_v12 = vld [vmem:[#allocation8] sm:$0xff]  }
  0x4d   :  { %473 = vmatprep.subr.bf16.mxu0 %v649_v0  ;;  %455 = vmatprep.subr.bf16.mxu1 %v649_v0  ;;  %v512_v13 = vld [vmem:[#allocation8 + $0x8] sm:$0xff]   ;;  %v513_v14 = vld [vmem:[#allocation8 + $0x10] sm:$0xff]   ;;  %v514_v15 = vld [vmem:[#allocation8 + $0x18] sm:$0xff]   ;;  %vm371_vm2 = vcmp.eq.s32.totalorder %v369_v37, 8  ;;  %vm370_vm3 = vcmp.lt.s32.totalorder %v369_v37, 8 }
  0x4e   :  { %v515_v16 = vld [vmem:[#allocation8 + $0x20] sm:$0xff]   ;;  %v516_v17 = vld [vmem:[#allocation8 + $0x28] sm:$0xff]   ;;  %v406_v18 = vld [vmem:[%s796_s2] ss:$0 sm:$0xff] }
  0x4f   :  { %450 = vmatmul.mubr.msk.bf16.vlgmr.msra.gmra.mrb[0].mxu0 %vm98_vm1, %v82_v3  ;;  %v517_v26 = vld [vmem:[#allocation8 + $0x30] sm:$0xff]   ;;  %v518_v27 = vld [vmem:[#allocation8 + $0x38] sm:$0xff]  }
  0x50   :  { %489 = vmatprep.mubr.msk.bf16.mxu0 %vm650_vm0, %v649_v0  ;;  %456 = vmatpush3.bf16.msra.mxu1 %v504_v5  ;;  %v409_v28 = vld [vmem:[%s798_s4] ss:$0 sm:$0xff]  ;;  %s651_s4 = smov [#allocation10]  }
  0x51   :  { %457 = vmatprep.subr.bf16.mxu1 %v649_v0  ;;  %474 = vmatpush3.bf16.msra.mxu0 %v511_v12  ;;  %v418_v38 = vld [vmem:[%s800_s6] ss:$0 sm:$0xff]  ;;  %s395_s6 = sshll.u32 %s651_s4, 4  ;;  %s396_s6 = int_to_ptr.vmem [resolvable:$true] %s395_s6 }
  0x52   :  { %475 = vmatprep.subr.bf16.mxu0 %v649_v0  ;;  %s613_s28 = scalar_lea.vmem %s396_s6, 128  ;;  %p618_p5 = scmp.lt.s32.totalorder %s396_s6, %s396_s6 }
  0x53   :  { %p614_p4 = scmp.ne.s32.totalorder %s396_s6, %s613_s28  ;;  %p619_p6 = scmp.lt.s32.totalorder %s613_s28, %s613_s28 }
  0x54   :  { %458 = vmatpush3.bf16.msra.mxu1 %v505_v6 }
  0x55   :  { %459 = vmatprep.subr.bf16.mxu1 %v649_v0  ;;  %476 = vmatpush3.bf16.msra.mxu0 %v512_v13  ;;  %p620_p7 = por %p619_p6, %p618_p5 }
  0x56   :  { %477 = vmatprep.subr.bf16.mxu0 %v649_v0 }
  0x57   :  { %p621_p8 = pnand %p620_p7, %p614_p4 }
  0x58   :  { %460 = vmatpush3.bf16.msra.mxu1 %v506_v7 }
  0x59   :  { %461 = vmatprep.subr.bf16.mxu1 %v649_v0  ;;  %478 = vmatpush3.bf16.msra.mxu0 %v513_v14 }
  0x5a   :  { %479 = vmatprep.subr.bf16.mxu0 %v649_v0 }
  0x5c   :  { %462 = vmatpush3.bf16.msra.mxu1 %v507_v8 }
  0x5d   :  { %463 = vmatprep.subr.bf16.mxu1 %v649_v0  ;;  %480 = vmatpush3.bf16.msra.mxu0 %v514_v15 }
  0x5e   :  { %481 = vmatprep.subr.bf16.mxu0 %v649_v0 }
  0x60   :  { %464 = vmatpush3.bf16.msra.mxu1 %v508_v9 }
  0x61   :  { %465 = vmatprep.subr.bf16.mxu1 %v649_v0  ;;  %482 = vmatpush3.bf16.msra.mxu0 %v515_v16 }
  0x62   :  { %483 = vmatprep.subr.bf16.mxu0 %v649_v0 }
  0x64   :  { %466 = vmatpush3.bf16.msra.mxu1 %v509_v10 }
  0x65   :  { %467 = vmatprep.subr.bf16.mxu1 %v649_v0  ;;  %484 = vmatpush3.bf16.msra.mxu0 %v516_v17 }
  0x66   :  { %485 = vmatprep.subr.bf16.mxu0 %v649_v0 }
  0x68   :  { %468 = vmatpush3.bf16.msra.mxu1 %v510_v11 }
  0x69   :  { %486 = vmatpush3.bf16.msra.mxu0 %v517_v26 }
  0x6a   :  { %487 = vmatprep.subr.bf16.mxu0 %v649_v0 }
  0x6d   :  { %488 = vmatpush3.bf16.msra.mxu0 %v518_v27 }
 0x122   :  { %v136_v19 = vpop.f32.mrb[0].mxu0 }
 0x123   :  { %v137_v20 = vadd.f32 %v406_v18, %v136_v19  ;;  %v451_v21 = vpop.f32.mrb[1].mxu0 }
 0x124   :  { %v139_v22 = vpop.f32.mrb[2].mxu0 }
 0x125   :  { %v142_v23 = vmax.f32 %v137_v20, 0.0  ;;  %v452_v24 = vpop.f32.mrb[3].mxu0 }
 0x127   :  { %v143_v25 = vpack.c.bf16 %v142_v23, %v142_v23 }
 0x129   :  { %470 = vmatmul.mubr.bf16.vlgmr.msra.gmra.mrb[0].mxu1 %v143_v25 }
 0x1fc   :  { %v249_v29 = vpop.f32.mrb[0].mxu1 }
 0x1fd   :  { %v250_v30 = vadd.f32 %v409_v28, %v249_v29  ;;  %v471_v31 = vpop.f32.mrb[1].mxu1 }
 0x1fe   :  { %v252_v32 = vpop.f32.mrb[2].mxu1 }
 0x1ff   :  { %v255_v33 = vmax.f32 %v250_v30, 0.0  ;;  %v472_v34 = vpop.f32.mrb[3].mxu1 }
 0x201   :  { %v256_v35 = vpack.c.bf16 %v255_v33, %v255_v33 }
 0x203   :  { %490 = vmatmul.mubr.bf16.vlgmr.msra.gmra.mrb[4].mxu0 %v256_v35 }
 0x2d6   :  { %v362_v39 = vpop.f32.mrb[4].mxu0 }
 0x2d7   :  { %v363_v40 = vadd.f32 %v418_v38, %v362_v39  ;;  %v491_v41 = vpop.f32.mrb[5].mxu0 }
 0x2d8   :  { %v365_v42 = vpop.f32.mrb[6].mxu0 }
 0x2d9   :  { %v492_v43 = vpop.f32.mrb[7].mxu0  ;;  %v382_v44 = vsel %vm371_vm2, %v363_v40, 0.0  ;;  %v372_v45 = vsel %vm370_vm3, %v363_v40, -inf }
 0x2da   :  { %383 = vadd.xlane.f32.xlu1 %v382_v44  ;;  %373 = vmax.xlane.f32.xlu0 %v372_v45 }
 0x367   :  { %v374_v46 = vpop.xlane.xlu0 %373  ;;  %v384_v50 = vpop.xlane.xlu1 %383 }
 0x368   :  { %v375_v47 = vsub.f32 %v372_v45, %v374_v46 }
 0x36a   :  { %v376_v48 = vmul.f32 1.442695, %v375_v47 }
 0x36c   :  { %519 = vpow2.f32 %v376_v48 }
 0x36d   :  { %521 = vtanh.f32 %v384_v50 }
 0x376   :  { %v520_v49 = vpop.eup %519 }
 0x377   :  { %378 = vadd.xlane.f32.xlu0 %v520_v49  ;;  %v522_v52 = vpop.eup %521 }
 0x378   :  { %v386_v55 = vsel %vm371_vm2, %v522_v52, 0.0 }
 0x404   :  { %v379_v51 = vpop.xlane.xlu0 %378 }
 0x405   :  { %523 = vrcp.f32 %v379_v51 }
 0x40f   :  { %v524_v53 = vpop.eup %523 }
 0x410   :  { %v381_v54 = vmul.f32 %v524_v53, %v520_v49 }
 0x412   :  { %v387_v56 = vsel %vm370_vm3, %v381_v54, %v386_v55 }
 0x413   :  { %388 = vst [vmem:[#allocation10] sm:$0xff] %v387_v56 }
 0x414   :  { %624 = shalt.err (!%p621_p8)
}
 0x415   :  { %s625_s8 = scalar_lea.hbm %s801_s7, 128 }
 0x416   :  { %p626_p9 = scmp.ne.s32.totalorder %s801_s7, %s625_s8  ;;  %p629_p10 = scmp.lt.u32.totalorder %s625_s8, %s801_s7 }
 0x418   :  { %p631_p11 = pnand %p629_p10, %p626_p9 }
 0x41a   :  { %634 = shalt.err (!%p631_p11)
}
 0x41b   :  { %398 = dma.vmem_to_hbm [thread:$0]  %s396_s6, 128, %s801_s7, [#allocation4]  }
 0x41c   :  { %641 = dma.done.wait [#allocation4], 128  }
 0x41d   :  { %642 = vsyncadd [#allocation4], 4294967168 }
 0x41e   :  { %402 = vsyncpa [#allocation3], 1 }
 0x41f   :  { %403 = vsyncpa [#allocation6], 1 }
 0x420   :  { %404 = vsyncpa [#allocation9], 1 }
 0x421   :  { %405 = vsyncpa [#allocation4], 1 }

</bundles_post_ra>
